<compile_context>
chip_gen: v7x
topology: tpu7x:2x2x1
jax: 0.10.0
libtpu: 0.0.40
codegen_flags: <defaults>
</compile_context>

<pallas_src>
import functools

import jax
import jax.numpy as jnp
from jax.experimental import pallas as pl
from jax.experimental.pallas import tpu as pltpu


def _round_up(v, m):
    return (v + m - 1) // m * m


def _patch_embed_kernel(p_ref, w_ref, b_ref, o_ref):
    # p_ref: (TM, Kpad) bf16   w_ref: (Kpad, Epad) bf16
    # b_ref: (1, Epad)  f32    o_ref: (TM, Epad)  f32
    acc = jnp.dot(p_ref[...], w_ref[...], preferred_element_type=jnp.float32)
    o_ref[...] = (acc + b_ref[...]).astype(o_ref.dtype)


def _im2col_nhwc(x_nchw, kh, kw, sh, sw, ph, pw):
    """Extract conv patches with K ordered (kh, kw, c).

    Transposes x to NHWC once and slices strided row/col slabs, avoiding the
    expensive 5-D stack+transpose XLA would emit for a (c, kh, kw) ordering.
    Returns [B, Hout, Wout, KH*KW*C].
    """
    B, C, H, W = x_nchw.shape
    hout = (H + 2 * ph - kh) // sh + 1
    wout = (W + 2 * pw - kw) // sw + 1
    x_nhwc = jnp.transpose(x_nchw, (0, 2, 3, 1))
    xp = jnp.pad(x_nhwc, ((0, 0), (ph, ph), (pw, pw), (0, 0)))
    slabs = []
    for i in range(kh):
        for j in range(kw):
            slabs.append(
                xp[:,
                   i:i + (hout - 1) * sh + 1:sh,
                   j:j + (wout - 1) * sw + 1:sw,
                   :])  # [B, Hout, Wout, C]
    patches = jnp.concatenate(slabs, axis=-1)  # [B, Hout, Wout, KH*KW*C]
    return patches, hout, wout


@functools.partial(jax.jit, static_argnames=("kernel_size", "stride", "padding"))
def patch_embed_forward(x, weight, bias, *, kernel_size=(7, 7), stride=(4, 4),
                        padding=(3, 3)):
    """x: [B, C, H, W] (NCHW).  weight: [E, C, KH, KW].  bias: [E].
    Returns NHWC [B, Hout, Wout, E] == conv2d(x).permute(0, 2, 3, 1)."""
    kh, kw = kernel_size
    sh, sw = stride
    ph, pw = padding
    B, C, H, W = x.shape
    E = weight.shape[0]
    K = C * kh * kw

    # TODO(synk): fully fuse im2col into the kernel (x in pl.ANY + manual
    # strided make_async_copy of kh row-slabs into VMEM) to remove the P
    # matrix HBM round-trip entirely.
    patches, hout, wout = _im2col_nhwc(x, kh, kw, sh, sw, ph, pw)
    M = B * hout * wout

    # Pad the contraction (K) and output (E) dims to lane multiples so every
    # MXU pass is full-width and every store is unmasked/lane-dense.
    k_pad = _round_up(K, 128)
    e_pad = _round_up(E, 128)

    # Tile M: cap the tile so double-buffered P/O tiles stay a few MiB
    # (safe even under v7x's halved VMEM); multiple of 16 for bf16 sublanes.
    TM_TARGET = 1024
    tm = min(TM_TARGET, _round_up(M, 16))
    m_pad = _round_up(M, tm)

    # bf16 inputs (HBM-bound op): halves P/W bytes and doubles MXU rate;
    # accumulation stays f32 via preferred_element_type.
    p2d = patches.reshape(M, K).astype(jnp.bfloat16)
    p2d = jnp.pad(p2d, ((0, m_pad - M), (0, k_pad - K)))

    # PyTorch weight [E, C, KH, KW] -> [KH, KW, C, E] -> [K, E] (matches the
    # (kh, kw, c) column order of the patch matrix).  In a real model this
    # padded weight/bias would be precomputed once outside the hot path.
    w2d = jnp.transpose(weight, (2, 3, 1, 0)).reshape(K, E).astype(jnp.bfloat16)
    w2d = jnp.pad(w2d, ((0, k_pad - K), (0, e_pad - E)))
    b2d = jnp.pad(bias.astype(jnp.float32).reshape(1, E), ((0, 0), (0, e_pad - E)))

    grid = (m_pad // tm,)
    out2d = pl.pallas_call(
        _patch_embed_kernel,
        out_shape=jax.ShapeDtypeStruct((m_pad, e_pad), jnp.float32),
        grid_spec=pltpu.PrefetchScalarGridSpec(
            num_scalar_prefetch=0,
            grid=grid,
            in_specs=[
                pl.BlockSpec((tm, k_pad), lambda i: (i, 0)),
                pl.BlockSpec((k_pad, e_pad), lambda i: (0, 0)),
                pl.BlockSpec((1, e_pad), lambda i: (0, 0)),
            ],
            out_specs=pl.BlockSpec((tm, e_pad), lambda i: (i, 0)),
        ),
        # "parallel" lets v7x shard the M tiles across both TensorCores.
        # Default scoped VMEM is plenty for these tiles; raise
        # vmem_limit_bytes only if TM_TARGET is increased on v5e/v6e.
        compiler_params=pltpu.CompilerParams(
            dimension_semantics=("parallel",)),
    )(p2d, w2d, b2d)

    out = out2d[:M, :E].reshape(B, hout, wout, E).astype(x.dtype)
    return out


def _reference_forward(x, weight, bias, kernel_size, stride, padding):
    """Plain-JAX f32 conv reference (NCHW conv + permute to NHWC)."""
    out = jax.lax.conv_general_dilated(
        x, weight,
        window_strides=stride,
        padding=[(padding[0], padding[0]), (padding[1], padding[1])],
        dimension_numbers=("NCHW", "OIHW", "NCHW"),
    )
    out = out + bias.reshape(1, -1, 1, 1)
    return jnp.transpose(out, (0, 2, 3, 1))


if __name__ == "__main__":
    # Small, deterministic example consistent with the module's __init__:
    #   kernel=(7,7), stride=(4,4), padding=(3,3), in_chans=4, embed_dim=32
    B, C, H, W = 2, 4, 16, 16
    E = 32
    KS, ST, PD = (7, 7), (4, 4), (3, 3)

    key = jax.random.PRNGKey(0)
    kx, kw_, kb = jax.random.split(key, 3)
    x = jax.random.normal(kx, (B, C, H, W), dtype=jnp.float32)
    fan_in = C * KS[0] * KS[1]
    weight = jax.random.normal(kw_, (E, C, KS[0], KS[1]), dtype=jnp.float32) / jnp.sqrt(fan_in)
    bias = jax.random.normal(kb, (E,), dtype=jnp.float32) * 0.01

    out = patch_embed_forward(x, weight, bias, kernel_size=KS, stride=ST, padding=PD)
    out = jax.block_until_ready(out)

    ref = _reference_forward(x, weight, bias, KS, ST, PD)
    assert out.shape == (B, 4, 4, E), out.shape
    # bf16 inputs (f32 accumulate) -> loosened tolerance vs the f32 reference.
    assert jnp.allclose(out, ref, atol=5e-2, rtol=5e-2), float(jnp.max(jnp.abs(out - ref)))

    print("KERNEL_OK")
</pallas_src>

<mosaic_0001>
module attributes {stable_mosaic.version = 11 : i64} {
  func.func @_patch_embed_kernel(%arg0: i32, %arg1: memref<32x256xbf16, #tpu.memory_space<vmem>>, %arg2: memref<256x128xbf16, #tpu.memory_space<vmem>>, %arg3: memref<1x128xf32, #tpu.memory_space<vmem>>, %arg4: memref<32x128xf32, #tpu.memory_space<vmem>>) attributes {dimension_semantics = [#tpu.dimension_semantics<parallel>], iteration_bounds = array<i64: 1>, scalar_prefetch = 0 : i64, scratch_operands = 0 : i64, tpu.core_type = #tpu.core_type<tc>, window_params = [{transform_indices = @transform_0, window_bounds = array<i64: 32, 256>}, {pipeline_mode = #tpu.pipeline_mode<synchronous>, transform_indices = @transform_1, window_bounds = array<i64: 256, 128>}, {pipeline_mode = #tpu.pipeline_mode<synchronous>, transform_indices = @transform_2, window_bounds = array<i64: 1, 128>}, {transform_indices = @transform_3, window_bounds = array<i64: 32, 128>}]} {
    %c0 = arith.constant 0 : index
    %c0_0 = arith.constant 0 : index
    %0 = vector.load %arg1[%c0, %c0_0] : memref<32x256xbf16, #tpu.memory_space<vmem>>, vector<32x256xbf16>
    %c0_1 = arith.constant 0 : index
    %c0_2 = arith.constant 0 : index
    %1 = vector.load %arg2[%c0_1, %c0_2] : memref<256x128xbf16, #tpu.memory_space<vmem>>, vector<256x128xbf16>
    %cst = arith.constant dense<0.000000e+00> : vector<32x128xf32>
    %2 = tpu.matmul %0, %1, %cst {dimension_numbers = #tpu.dot_dimension_numbers<[1], [0], [0], [1], [0, 0, 1, 1], [], []>} : vector<32x256xbf16>, vector<256x128xbf16>, vector<32x128xf32> -> vector<32x128xf32>
    %c0_3 = arith.constant 0 : index
    %c0_4 = arith.constant 0 : index
    %3 = vector.load %arg3[%c0_3, %c0_4] : memref<1x128xf32, #tpu.memory_space<vmem>>, vector<1x128xf32>
    %4 = vector.broadcast %3 : vector<1x128xf32> to vector<32x128xf32>
    %5 = arith.addf %2, %4 : vector<32x128xf32>
    %c0_5 = arith.constant 0 : index
    %c0_6 = arith.constant 0 : index
    %6 = vector.load %arg4[%c0_5, %c0_6] : memref<32x128xf32, #tpu.memory_space<vmem>>, vector<32x128xf32>
    tpu.vector_store %arg4[%c0_5, %c0_6], %5 {strides = array<i32>} : memref<32x128xf32, #tpu.memory_space<vmem>>, vector<32x128xf32>,
    return
  }
  func.func @transform_0(%arg0: i32) -> (i32, i32) {
    %c0_i32 = arith.constant 0 : i32
    %c0_i32_0 = arith.constant 0 : i32
    return %arg0, %c0_i32 : i32, i32
  }
  func.func @transform_1(%arg0: i32) -> (i32, i32) {
    %c0_i32 = arith.constant 0 : i32
    %c0_i32_0 = arith.constant 0 : i32
    %c0_i32_1 = arith.constant 0 : i32
    return %c0_i32, %c0_i32_0 : i32, i32
  }
  func.func @transform_2(%arg0: i32) -> (i32, i32) {
    %c0_i32 = arith.constant 0 : i32
    %c0_i32_0 = arith.constant 0 : i32
    %c0_i32_1 = arith.constant 0 : i32
    return %c0_i32, %c0_i32_0 : i32, i32
  }
  func.func @transform_3(%arg0: i32) -> (i32, i32) {
    %c0_i32 = arith.constant 0 : i32
    %c0_i32_0 = arith.constant 0 : i32
    return %arg0, %c0_i32 : i32, i32
  }
}

</mosaic_0001>

<bundles_post_ra>
// kernel: patch_embed_forward.1
= control target key start
LH: loop header
LB: loop body
LE: loop exit
PB: predicated region body
PF: predicated region fallthrough
CT: control target
= control target key end

     0   :  { %s456_s0 = inlined_call_operand.vmem [shape: bf16[32,256], index: 0, kind: input, shape index: {}]   ;;  %s457_s1 = inlined_call_operand.vmem [shape: bf16[256,128], index: 1, kind: input, shape index: {}]   ;;  %s458_s2 = inlined_call_operand.vmem [shape: f32[1,128], index: 2, kind: input, shape index: {}]   ;;  %s459_s3 = inlined_call_operand.hbm [shape: f32[32,128], index: 3, kind: output, shape index: {}]  }
   0x1   :  { %v312_v0 = vld [vmem:[%s457_s1 + $0x40] sm:$0xff]   ;;  %v314_v2 = vld [vmem:[%s457_s1 + $0x48] sm:$0xff]   ;;  %v316_v4 = vld [vmem:[%s457_s1 + $0x50] sm:$0xff]  }
   0x2   :  { %v313_v1 = vld [vmem:[%s457_s1] sm:$0xff]   ;;  %265 = vmatprep.subr.bf16.mxu0 %v312_v0  ;;  %293 = vmatprep.subr.bf16.mxu1 %v312_v0  ;;  %v315_v3 = vld [vmem:[%s457_s1 + $0x8] sm:$0xff]   ;;  %v317_v5 = vld [vmem:[%s457_s1 + $0x10] sm:$0xff]  }
   0x3   :  { %266 = vmatpush3.bf16.msra.mxu0 %v313_v1  ;;  %301 = vmatpush3.bf16.msra.mxu1 %v313_v1  ;;  %v318_v6 = vld [vmem:[%s457_s1 + $0x58] sm:$0xff]   ;;  %v320_v8 = vld [vmem:[%s457_s1 + $0x60] sm:$0xff]   ;;  %v322_v10 = vld [vmem:[%s457_s1 + $0x68] sm:$0xff]  }
   0x4   :  { %267 = vmatprep.subr.bf16.mxu0 %v314_v2  ;;  %294 = vmatprep.subr.bf16.mxu1 %v314_v2  ;;  %v319_v7 = vld [vmem:[%s457_s1 + $0x18] sm:$0xff]   ;;  %v321_v9 = vld [vmem:[%s457_s1 + $0x20] sm:$0xff]  }
   0x5   :  { %v330_v11 = vld [vmem:[%s456_s0 + $0x4] ss:$8 sps:$4 sm:$0xff]   ;;  %v333_v12 = vld [vmem:[%s456_s0 + $0x14] ss:$8 sps:$4 sm:$0xff]  }
   0x7   :  { %268 = vmatpush3.bf16.msra.mxu0 %v315_v3  ;;  %302 = vmatpush3.bf16.msra.mxu1 %v315_v3 }
   0x8   :  { %269 = vmatprep.subr.bf16.mxu0 %v316_v4  ;;  %295 = vmatprep.subr.bf16.mxu1 %v316_v4 }
   0xb   :  { %270 = vmatpush3.bf16.msra.mxu0 %v317_v5  ;;  %303 = vmatpush3.bf16.msra.mxu1 %v317_v5 }
   0xc   :  { %271 = vmatprep.subr.bf16.mxu0 %v318_v6  ;;  %296 = vmatprep.subr.bf16.mxu1 %v318_v6 }
   0xf   :  { %272 = vmatpush3.bf16.msra.mxu0 %v319_v7  ;;  %304 = vmatpush3.bf16.msra.mxu1 %v319_v7 }
  0x10   :  { %273 = vmatprep.subr.bf16.mxu0 %v320_v8  ;;  %297 = vmatprep.subr.bf16.mxu1 %v320_v8 }
  0x11   :  { %8 = vsyncpa [#allocation3], 0  ;;  %v323_v13 = vld [vmem:[%s457_s1 + $0x28] sm:$0xff]   ;;  %v324_v14 = vld [vmem:[%s457_s1 + $0x70] sm:$0xff]   ;;  %207 = vmatprep.mubr.bf16.mxu0 %v330_v11  ;;  %215 = vmatprep.mubr.bf16.mxu1 %v333_v12 }
  0x12   :  { %v325_v15 = vld [vmem:[%s457_s1 + $0x30] sm:$0xff]   ;;  %v326_v16 = vld [vmem:[%s457_s1 + $0x78] sm:$0xff]   ;;  %v328_v18 = vld [vmem:[%s456_s0] ss:$8 sps:$4 sm:$0xff]  }
  0x13   :  { %274 = vmatpush3.bf16.msra.mxu0 %v321_v9  ;;  %305 = vmatpush3.bf16.msra.mxu1 %v321_v9  ;;  %v327_v17 = vld [vmem:[%s457_s1 + $0x38] sm:$0xff]   ;;  %v244_v22 = vld [vmem:[%s458_s2] ss:$0 sm:$0xff]  ;;  %s358_s1 = smov [#allocation2]  }
  0x14   :  { %275 = vmatprep.subr.bf16.mxu0 %v322_v10  ;;  %298 = vmatprep.subr.bf16.mxu1 %v322_v10  ;;  %v331_v19 = vld [vmem:[%s456_s0 + $0x10] ss:$8 sps:$4 sm:$0xff]   ;;  %s233_s27 = sshll.u32 %s358_s1, 4  ;;  %s234_s27 = int_to_ptr.vmem [resolvable:$true] %s233_s27 }
  0x15   :  { %s334_s0 = scalar_lea.vmem %s234_s27, 512  ;;  %p339_p1 = scmp.lt.s32.totalorder %s234_s27, %s234_s27 }
  0x16   :  { %p335_p0 = scmp.ne.s32.totalorder %s234_s27, %s334_s0  ;;  %p340_p2 = scmp.lt.s32.totalorder %s334_s0, %s334_s0 }
  0x17   :  { %276 = vmatpush3.bf16.msra.mxu0 %v323_v13  ;;  %306 = vmatpush3.bf16.msra.mxu1 %v323_v13 }
  0x18   :  { %277 = vmatprep.subr.bf16.mxu0 %v324_v14  ;;  %299 = vmatprep.subr.bf16.mxu1 %v324_v14  ;;  %p341_p3 = por %p340_p2, %p339_p1 }
  0x1a   :  { %p342_p4 = pnand %p341_p3, %p335_p0 }
  0x1b   :  { %278 = vmatpush3.bf16.msra.mxu0 %v325_v15  ;;  %307 = vmatpush3.bf16.msra.mxu1 %v325_v15 }
  0x1c   :  { %279 = vmatprep.subr.bf16.mxu0 %v326_v16  ;;  %300 = vmatprep.subr.bf16.mxu1 %v326_v16 }
  0x1f   :  { %280 = vmatpush3.bf16.msra.mxu0 %v327_v17  ;;  %308 = vmatpush3.bf16.msra.mxu1 %v327_v17 }
  0x22   :  { %208 = vmatmul.mubr.bf16.vlgmr.msra.gmra.mrb[0].mxu0 %v328_v18  ;;  %216 = vmatmul.mubr.bf16.vlgmr.msra.gmra.mrb[0].mxu1 %v331_v19 }
  0xf5   :  { %v281_v20 = vpop.f32.mrb[0].mxu0  ;;  %v287_v21 = vpop.f32.mrb[0].mxu1 }
  0xf6   :  { %v282_v23 = vpop.f32.mrb[1].mxu0  ;;  %v288_v24 = vpop.f32.mrb[1].mxu1 }
  0xf7   :  { %v283_v25 = vadd.f32 %v282_v23, %v281_v20  ;;  %v289_v26 = vadd.f32 %v288_v24, %v287_v21  ;;  %v284_v27 = vpop.f32.mrb[2].mxu0  ;;  %v290_v28 = vpop.f32.mrb[2].mxu1 }
  0xf8   :  { %v285_v29 = vpop.f32.mrb[3].mxu0  ;;  %v291_v30 = vpop.f32.mrb[3].mxu1 }
  0xf9   :  { %v210_v31 = vadd.f32 %v283_v25, %v244_v22  ;;  %v218_v32 = vadd.f32 %v289_v26, %v244_v22  ;;  %v286_v33 = vadd.f32 %v285_v29, %v284_v27  ;;  %v292_v34 = vadd.f32 %v291_v30, %v290_v28 }
  0xfb   :  { %224 = vst [vmem:[#allocation2] sm:$0xff] %v210_v31  ;;  %226 = vst [vmem:[#allocation2 + $0x10] sm:$0xff] %v218_v32  ;;  %v213_v35 = vadd.f32 %v286_v33, %v244_v22  ;;  %v221_v36 = vadd.f32 %v292_v34, %v244_v22 }
  0xfd   :  { %225 = vst [vmem:[#allocation2 + $0x8] sm:$0xff] %v213_v35  ;;  %227 = vst [vmem:[#allocation2 + $0x18] sm:$0xff] %v221_v36 }
  0xfe   :  { %345 = shalt.err (!%p342_p4)
}
  0xff   :  { %s346_s29 = scalar_lea.hbm %s459_s3, 512 }
 0x100   :  { %p347_p5 = scmp.ne.s32.totalorder %s459_s3, %s346_s29  ;;  %p350_p6 = scmp.lt.u32.totalorder %s346_s29, %s459_s3 }
 0x102   :  { %p352_p7 = pnand %p350_p6, %p347_p5 }
 0x104   :  { %355 = shalt.err (!%p352_p7)
}
 0x105   :  { %s359_s7 = smov 128   ;;  %s360_s8 = smov 8  }
 0x106   :  { %239 = dma.vmem_to_hbm [thread:$0]  %s234_s27, 512, %s459_s3, [#allocation3], %s359_s7, %s359_s7, %s360_s8  }
 0x107   :  { %356 = dma.done.wait [#allocation3], 512  }
 0x108   :  { %357 = vsyncadd [#allocation3], 4294966784 }
 0x109   :  { %243 = vsyncpa [#allocation3], 1 }

</bundles_post_ra>
